<compile_context>
chip_gen: v7x
topology: tpu7x:2x2x1
jax: 0.10.0
libtpu: 0.0.40
codegen_flags: <defaults>
</compile_context>

<pallas_src>
import functools

import jax
import jax.numpy as jnp
from jax.experimental import pallas as pl
from jax.experimental.pallas import tpu as pltpu

# ----------------------------- model sizes (small, synthetic) ----------------
B = 2          # batch
S = 8          # sequence length
H = 32         # hidden size
F = 4 * H      # FFN inner size
V = 64         # vocab size
LN_EPS = 1e-12
NEG_INF = 1e9


def _gelu_tanh(x):
    # tanh-approximate GELU (VPU + EUP tanh).
    # TODO(synk): HF BERT uses the erf-based GELU; tanh approximation differs at ~1e-3.
    return 0.5 * x * (1.0 + jnp.tanh(0.7978845608028654 * (x + 0.044715 * x * x * x)))


def _layernorm(x, gamma, beta):
    mu = jnp.mean(x, axis=-1, keepdims=True)
    var = jnp.mean((x - mu) * (x - mu), axis=-1, keepdims=True)
    return (x - mu) * jax.lax.rsqrt(var + LN_EPS) * gamma + beta


# ----------------------------- Pallas kernel ---------------------------------
def encoder_pool_kernel(
    x_ref,      # [S, H]      f32  embedded + LN0 rows of ONE example (grid over batch)
    kv_ref,     # [1, S]      f32  key-validity mask (1 = real token, 0 = padding)
    wqkv_ref,   # [H, 3H]     bf16 fused Wq|Wk|Wv (1/sqrt(H) folded into Wq/bq)
    wow2_ref,   # [H+F, H]    bf16 rows 0:H = Wo, rows H:H+F = W2
    w1_ref,     # [H, F]      bf16
    brow_ref,   # [1, 3H+F]   f32  bq(scaled)|bk|bv | b1
    vec_ref,    # [6, H]      f32  rows: bo, ln1_g, ln1_b, b2, ln2_g, ln2_b
    out_ref,    # [1, H]      f32  pooled embedding of this example
    *,
    use_cls,
):
    x = x_ref[...]                              # [S, H] f32
    x_bf = x.astype(jnp.bfloat16)
    b_all = brow_ref[...]                       # [1, 3H+F] f32

    # --- fused QKV projection: one wide MXU push, slice the result -----------
    qkv = jnp.dot(x_bf, wqkv_ref[...],
                  preferred_element_type=jnp.float32) + b_all[:, 0:3 * H]   # [S, 3H]
    q = qkv[:, 0:H]                             # scale already folded into Wq/bq
    k = qkv[:, H:2 * H]
    v = qkv[:, 2 * H:3 * H]

    # --- attention (single head; per-example grid => no cross-example mask) --
    scores = jax.lax.dot_general(
        q.astype(jnp.bfloat16), k.astype(jnp.bfloat16),
        dimension_numbers=(((1,), (1,)), ((), ())),     # q @ k^T, no XLU transpose
        preferred_element_type=jnp.float32)             # [S, S]

    kvalid = kv_ref[...]                                # [1, S]
    scores = scores + (kvalid - 1.0) * NEG_INF          # key-padding bias, broadcast add

    scores = scores - jnp.max(scores, axis=-1, keepdims=True)
    p = jnp.exp(scores)
    # approx reciprocal runs on the EUP slot (~free); ~1e-3 rel. error vs exact divide.
    p = p * pl.reciprocal(jnp.sum(p, axis=-1, keepdims=True), approx=True)

    wo = wow2_ref[0:H, :]                               # [H, H] bf16 (sublane-aligned slice)
    w2 = wow2_ref[H:H + F, :]                           # [F, H] bf16
    ctx = jnp.dot(p.astype(jnp.bfloat16), v.astype(jnp.bfloat16),
                  preferred_element_type=jnp.float32)                      # [S, H]
    attn_out = jnp.dot(ctx.astype(jnp.bfloat16), wo,
                       preferred_element_type=jnp.float32) + vec_ref[0:1, :]

    h = _layernorm(x + attn_out, vec_ref[1:2, :], vec_ref[2:3, :])         # [S, H] f32

    # --- feed-forward ---------------------------------------------------------
    f = jnp.dot(h.astype(jnp.bfloat16), w1_ref[...],
                preferred_element_type=jnp.float32) + b_all[:, 3 * H:]     # [S, F]
    f = _gelu_tanh(f)
    f = jnp.dot(f.astype(jnp.bfloat16), w2,
                preferred_element_type=jnp.float32) + vec_ref[3:4, :]      # [S, H]

    h2 = _layernorm(h + f, vec_ref[4:5, :], vec_ref[5:6, :])               # [S, H]

    # --- pooling (static flag: either CLS row read or in-kernel masked mean) --
    if use_cls:
        out_ref[...] = h2[0:1, :]                                          # token 0
    else:
        denom = jnp.maximum(jnp.sum(kvalid), 1.0)
        w_row = kvalid / denom                                             # [1, S]
        out_ref[...] = jnp.dot(w_row, h2, preferred_element_type=jnp.float32)


# ----------------------------- wrapper ---------------------------------------
@functools.partial(jax.jit, static_argnames=("use_cls",))
def embedder_forward(input_ids, attention_mask, params, use_cls=False):
    """Embedding lookup + embedding LayerNorm in plain JAX, then one Pallas
    encoder-layer + pooling kernel, gridded over the batch (parallel axis)."""
    Bq, Sq = input_ids.shape

    tok = params["tok_emb"][input_ids]                        # [B, S, H]
    pos = params["pos_emb"][None, :Sq, :]                     # [1, S, H]
    x = _layernorm((tok + pos).astype(jnp.float32), params["ln0_g"], params["ln0_b"])
    key_valid = attention_mask.astype(jnp.float32).reshape(Bq, 1, Sq)      # [B, 1, S]

    kernel = functools.partial(encoder_pool_kernel, use_cls=use_cls)
    pooled = pl.pallas_call(
        kernel,
        out_shape=jax.ShapeDtypeStruct((Bq, 1, H), jnp.float32),
        grid=(Bq,),
        in_specs=[
            pl.BlockSpec((None, Sq, H), lambda b: (b, 0, 0)),        # x: one example per step
            pl.BlockSpec((None, 1, Sq), lambda b: (b, 0, 0)),        # key_valid row
            pl.BlockSpec((H, 3 * H), lambda b: (0, 0)),              # wqkv   (resident)
            pl.BlockSpec((H + F, H), lambda b: (0, 0)),              # wo|w2  (resident)
            pl.BlockSpec((H, F), lambda b: (0, 0)),                  # w1     (resident)
            pl.BlockSpec((1, 3 * H + F), lambda b: (0, 0)),          # biases (resident)
            pl.BlockSpec((6, H), lambda b: (0, 0)),                  # LN/bias vec (resident)
        ],
        out_specs=pl.BlockSpec((None, 1, H), lambda b: (b, 0, 0)),
        compiler_params=pltpu.CompilerParams(dimension_semantics=("parallel",)),
    )(x, key_valid, params["wqkv"], params["wow2"], params["w1"],
      params["brow"], params["vec"])
    return pooled.reshape(Bq, H)


# ----------------------------- deterministic params --------------------------
def init_params(key):
    ks = jax.random.split(key, 12)
    std = 0.02
    scale = 1.0 / jnp.sqrt(jnp.float32(H))

    wq = jax.random.normal(ks[2], (H, H), jnp.float32) * std
    wk = jax.random.normal(ks[3], (H, H), jnp.float32) * std
    wv = jax.random.normal(ks[4], (H, H), jnp.float32) * std
    wo = jax.random.normal(ks[5], (H, H), jnp.float32) * std
    w1 = jax.random.normal(ks[6], (H, F), jnp.float32) * std
    w2 = jax.random.normal(ks[7], (F, H), jnp.float32) * std

    bq = jax.random.normal(ks[8], (1, H), jnp.float32) * std
    bk = jax.random.normal(ks[9], (1, H), jnp.float32) * std
    bv = jax.random.normal(ks[10], (1, H), jnp.float32) * std
    bo = jax.random.normal(ks[11], (1, H), jnp.float32) * std
    b1 = jnp.zeros((1, F), jnp.float32)
    b2 = jnp.zeros((1, H), jnp.float32)
    ln1_g = jnp.ones((1, H), jnp.float32)
    ln1_b = jnp.zeros((1, H), jnp.float32)
    ln2_g = jnp.ones((1, H), jnp.float32)
    ln2_b = jnp.zeros((1, H), jnp.float32)

    # 1/sqrt(H) softmax scale folded into the query projection (weights + bias).
    wqkv = jnp.concatenate([wq * scale, wk, wv], axis=1).astype(jnp.bfloat16)  # [H, 3H]
    wow2 = jnp.concatenate([wo, w2], axis=0).astype(jnp.bfloat16)              # [H+F, H]
    brow = jnp.concatenate([bq * scale, bk, bv, b1], axis=1)                   # [1, 3H+F]
    vec = jnp.concatenate([bo, ln1_g, ln1_b, b2, ln2_g, ln2_b], axis=0)        # [6, H]

    return {
        "tok_emb": jax.random.normal(ks[0], (V, H), jnp.float32) * std,
        "pos_emb": jax.random.normal(ks[1], (S, H), jnp.float32) * std,
        "ln0_g": jnp.ones((1, H), jnp.float32),
        "ln0_b": jnp.zeros((1, H), jnp.float32),
        "wqkv": wqkv,
        "wow2": wow2,
        "w1": w1.astype(jnp.bfloat16),
        "brow": brow,
        "vec": vec,
    }


# TODO(synk): the original module loads arbitrary pretrained HF weights (multi-layer,
# multi-head); a single deterministic synthetic encoder layer stands in for it here.

if __name__ == "__main__":
    key = jax.random.PRNGKey(0)
    pkey, ikey = jax.random.split(key)
    params = init_params(pkey)

    input_ids = jax.random.randint(ikey, (B, S), 0, V, dtype=jnp.int32)
    # last 2 tokens of the second example are padding
    attention_mask = jnp.array([[1] * S, [1] * (S - 2) + [0, 0]], dtype=jnp.int32)

    # mean pooling path (use_CLS = False)
    emb_mean = embedder_forward(input_ids, attention_mask, params, use_cls=False)
    # CLS pooling path (use_CLS = True)
    emb_cls = embedder_forward(input_ids, attention_mask, params, use_cls=True)

    jax.block_until_ready(emb_mean)
    jax.block_until_ready(emb_cls)

    assert emb_mean.shape == (B, H) and emb_cls.shape == (B, H)
    assert bool(jnp.all(jnp.isfinite(emb_mean))) and bool(jnp.all(jnp.isfinite(emb_cls)))
    print("KERNEL_OK")
</pallas_src>

<mosaic_0001>
module attributes {stable_mosaic.version = 11 : i64} {
  func.func @encoder_pool_kernel(%arg0: i32, %arg1: memref<1x8x32xf32, #tpu.memory_space<vmem>>, %arg2: memref<1x1x8xf32, #tpu.memory_space<vmem>>, %arg3: memref<32x96xbf16, #tpu.memory_space<vmem>>, %arg4: memref<160x32xbf16, #tpu.memory_space<vmem>>, %arg5: memref<32x128xbf16, #tpu.memory_space<vmem>>, %arg6: memref<1x224xf32, #tpu.memory_space<vmem>>, %arg7: memref<6x32xf32, #tpu.memory_space<vmem>>, %arg8: memref<1x1x32xf32, #tpu.memory_space<vmem>>) attributes {dimension_semantics = [#tpu.dimension_semantics<parallel>], iteration_bounds = array<i64: 2>, scalar_prefetch = 0 : i64, scratch_operands = 0 : i64, tpu.core_type = #tpu.core_type<tc>, window_params = [{transform_indices = @transform_0, window_bounds = array<i64: 1, 8, 32>}, {transform_indices = @transform_1, window_bounds = array<i64: 1, 1, 8>}, {pipeline_mode = #tpu.pipeline_mode<synchronous>, transform_indices = @transform_2, window_bounds = array<i64: 32, 96>}, {pipeline_mode = #tpu.pipeline_mode<synchronous>, transform_indices = @transform_3, window_bounds = array<i64: 160, 32>}, {pipeline_mode = #tpu.pipeline_mode<synchronous>, transform_indices = @transform_4, window_bounds = array<i64: 32, 128>}, {pipeline_mode = #tpu.pipeline_mode<synchronous>, transform_indices = @transform_5, window_bounds = array<i64: 1, 224>}, {pipeline_mode = #tpu.pipeline_mode<synchronous>, transform_indices = @transform_6, window_bounds = array<i64: 6, 32>}, {transform_indices = @transform_7, window_bounds = array<i64: 1, 1, 32>}]} {
    %c0 = arith.constant 0 : index
    %c0_0 = arith.constant 0 : index
    %c0_1 = arith.constant 0 : index
    %0 = vector.load %arg1[%c0, %c0_0, %c0_1] : memref<1x8x32xf32, #tpu.memory_space<vmem>>, vector<1x8x32xf32>
    %1 = vector.shape_cast %0 : vector<1x8x32xf32> to vector<8x32xf32>
    %2 = arith.truncf %1 : vector<8x32xf32> to vector<8x32xbf16>
    %c0_2 = arith.constant 0 : index
    %c0_3 = arith.constant 0 : index
    %3 = vector.load %arg6[%c0_2, %c0_3] : memref<1x224xf32, #tpu.memory_space<vmem>>, vector<1x224xf32>
    %c0_4 = arith.constant 0 : index
    %c0_5 = arith.constant 0 : index
    %4 = vector.load %arg3[%c0_4, %c0_5] : memref<32x96xbf16, #tpu.memory_space<vmem>>, vector<32x96xbf16>
    %cst = arith.constant dense<0.000000e+00> : vector<8x96xf32>
    %5 = tpu.matmul %2, %4, %cst {dimension_numbers = #tpu.dot_dimension_numbers<[1], [0], [0], [1], [0, 0, 1, 1], [], []>} : vector<8x32xbf16>, vector<32x96xbf16>, vector<8x96xf32> -> vector<8x96xf32>
    %6 = vector.extract_strided_slice %3 {offsets = [0, 0], sizes = [1, 96], strides = [1, 1]} : vector<1x224xf32> to vector<1x96xf32>
    %7 = vector.broadcast %6 : vector<1x96xf32> to vector<8x96xf32>
    %8 = arith.addf %5, %7 : vector<8x96xf32>
    %9 = vector.extract_strided_slice %8 {offsets = [0, 0], sizes = [8, 32], strides = [1, 1]} : vector<8x96xf32> to vector<8x32xf32>
    %10 = vector.extract_strided_slice %8 {offsets = [0, 32], sizes = [8, 32], strides = [1, 1]} : vector<8x96xf32> to vector<8x32xf32>
    %11 = vector.extract_strided_slice %8 {offsets = [0, 64], sizes = [8, 32], strides = [1, 1]} : vector<8x96xf32> to vector<8x32xf32>
    %12 = arith.truncf %9 : vector<8x32xf32> to vector<8x32xbf16>
    %13 = arith.truncf %10 : vector<8x32xf32> to vector<8x32xbf16>
    %cst_6 = arith.constant dense<0.000000e+00> : vector<8x8xf32>
    %14 = tpu.matmul %12, %13, %cst_6 {dimension_numbers = #tpu.dot_dimension_numbers<[1], [1], [0], [0], [0, 0, 1, 0], [], []>} : vector<8x32xbf16>, vector<8x32xbf16>, vector<8x8xf32> -> vector<8x8xf32>
    %c0_7 = arith.constant 0 : index
    %c0_8 = arith.constant 0 : index
    %c0_9 = arith.constant 0 : index
    %15 = vector.load %arg2[%c0_7, %c0_8, %c0_9] : memref<1x1x8xf32, #tpu.memory_space<vmem>>, vector<1x1x8xf32>
    %16 = vector.shape_cast %15 : vector<1x1x8xf32> to vector<1x8xf32>
    %cst_10 = arith.constant 1.000000e+00 : f32
    %17 = vector.broadcast %cst_10 : f32 to vector<1x8xf32>
    %18 = arith.subf %16, %17 : vector<1x8xf32>
    %cst_11 = arith.constant 1.000000e+09 : f32
    %19 = vector.broadcast %cst_11 : f32 to vector<1x8xf32>
    %20 = arith.mulf %18, %19 : vector<1x8xf32>
    %21 = vector.broadcast %20 : vector<1x8xf32> to vector<8x8xf32>
    %22 = arith.addf %14, %21 : vector<8x8xf32>
    %cst_12 = arith.constant dense<0xFF800000> : vector<8xf32>
    %23 = vector.multi_reduction <maximumf>, %22, %cst_12 [1] : vector<8x8xf32> to vector<8xf32>
    %24 = vector.shape_cast %23 : vector<8xf32> to vector<8x1xf32>
    %25 = vector.broadcast %24 : vector<8x1xf32> to vector<8x8xf32>
    %26 = arith.subf %22, %25 : vector<8x8xf32>
    %27 = math.exp %26 : vector<8x8xf32>
    %cst_13 = arith.constant dense<0.000000e+00> : vector<8xf32>
    %28 = vector.multi_reduction <add>, %27, %cst_13 [1] : vector<8x8xf32> to vector<8xf32>
    %29 = vector.shape_cast %28 : vector<8xf32> to vector<8x1xf32>
    %30 = tpu.reciprocal %29 {approx = true} : vector<8x1xf32> -> vector<8x1xf32>
    %31 = vector.broadcast %30 : vector<8x1xf32> to vector<8x8xf32>
    %32 = arith.mulf %27, %31 : vector<8x8xf32>
    %c0_14 = arith.constant 0 : index
    %c0_15 = arith.constant 0 : index
    %33 = vector.load %arg4[%c0_14, %c0_15] : memref<160x32xbf16, #tpu.memory_space<vmem>>, vector<32x32xbf16>
    %c32 = arith.constant 32 : index
    %c0_16 = arith.constant 0 : index
    %34 = vector.load %arg4[%c32, %c0_16] : memref<160x32xbf16, #tpu.memory_space<vmem>>, vector<128x32xbf16>
    %35 = arith.truncf %32 : vector<8x8xf32> to vector<8x8xbf16>
    %36 = arith.truncf %11 : vector<8x32xf32> to vector<8x32xbf16>
    %cst_17 = arith.constant dense<0.000000e+00> : vector<8x32xf32>
    %37 = tpu.matmul %35, %36, %cst_17 {dimension_numbers = #tpu.dot_dimension_numbers<[1], [0], [0], [1], [0, 0, 1, 1], [], []>} : vector<8x8xbf16>, vector<8x32xbf16>, vector<8x32xf32> -> vector<8x32xf32>
    %38 = arith.truncf %37 : vector<8x32xf32> to vector<8x32xbf16>
    %cst_18 = arith.constant dense<0.000000e+00> : vector<8x32xf32>
    %39 = tpu.matmul %38, %33, %cst_18 {dimension_numbers = #tpu.dot_dimension_numbers<[1], [0], [0], [1], [0, 0, 1, 1], [], []>} : vector<8x32xbf16>, vector<32x32xbf16>, vector<8x32xf32> -> vector<8x32xf32>
    %c0_19 = arith.constant 0 : index
    %c0_20 = arith.constant 0 : index
    %40 = vector.load %arg7[%c0_19, %c0_20] : memref<6x32xf32, #tpu.memory_space<vmem>>, vector<1x32xf32>
    %41 = vector.broadcast %40 : vector<1x32xf32> to vector<8x32xf32>
    %42 = arith.addf %39, %41 : vector<8x32xf32>
    %43 = arith.addf %1, %42 : vector<8x32xf32>
    %c1 = arith.constant 1 : index
    %c0_21 = arith.constant 0 : index
    %44 = vector.load %arg7[%c1, %c0_21] : memref<6x32xf32, #tpu.memory_space<vmem>>, vector<1x32xf32>
    %c2 = arith.constant 2 : index
    %c0_22 = arith.constant 0 : index
    %45 = vector.load %arg7[%c2, %c0_22] : memref<6x32xf32, #tpu.memory_space<vmem>>, vector<1x32xf32>
    %cst_23 = arith.constant dense<0.000000e+00> : vector<8xf32>
    %46 = vector.multi_reduction <add>, %43, %cst_23 [1] : vector<8x32xf32> to vector<8xf32>
    %47 = vector.shape_cast %46 : vector<8xf32> to vector<8x1xf32>
    %cst_24 = arith.constant 3.200000e+01 : f32
    %48 = vector.broadcast %cst_24 : f32 to vector<8x1xf32>
    %49 = arith.divf %47, %48 : vector<8x1xf32>
    %50 = vector.broadcast %49 : vector<8x1xf32> to vector<8x32xf32>
    %51 = arith.subf %43, %50 : vector<8x32xf32>
    %52 = vector.broadcast %49 : vector<8x1xf32> to vector<8x32xf32>
    %53 = arith.subf %43, %52 : vector<8x32xf32>
    %54 = arith.mulf %51, %53 : vector<8x32xf32>
    %cst_25 = arith.constant dense<0.000000e+00> : vector<8xf32>
    %55 = vector.multi_reduction <add>, %54, %cst_25 [1] : vector<8x32xf32> to vector<8xf32>
    %56 = vector.shape_cast %55 : vector<8xf32> to vector<8x1xf32>
    %cst_26 = arith.constant 3.200000e+01 : f32
    %57 = vector.broadcast %cst_26 : f32 to vector<8x1xf32>
    %58 = arith.divf %56, %57 : vector<8x1xf32>
    %59 = vector.broadcast %49 : vector<8x1xf32> to vector<8x32xf32>
    %60 = arith.subf %43, %59 : vector<8x32xf32>
    %cst_27 = arith.constant 9.99999996E-13 : f32
    %61 = vector.broadcast %cst_27 : f32 to vector<8x1xf32>
    %62 = arith.addf %58, %61 : vector<8x1xf32>
    %63 = math.rsqrt %62 : vector<8x1xf32>
    %64 = vector.broadcast %63 : vector<8x1xf32> to vector<8x32xf32>
    %65 = arith.mulf %60, %64 : vector<8x32xf32>
    %66 = vector.broadcast %44 : vector<1x32xf32> to vector<8x32xf32>
    %67 = arith.mulf %65, %66 : vector<8x32xf32>
    %68 = vector.broadcast %45 : vector<1x32xf32> to vector<8x32xf32>
    %69 = arith.addf %67, %68 : vector<8x32xf32>
    %70 = arith.truncf %69 : vector<8x32xf32> to vector<8x32xbf16>
    %c0_28 = arith.constant 0 : index
    %c0_29 = arith.constant 0 : index
    %71 = vector.load %arg5[%c0_28, %c0_29] : memref<32x128xbf16, #tpu.memory_space<vmem>>, vector<32x128xbf16>
    %cst_30 = arith.constant dense<0.000000e+00> : vector<8x128xf32>
    %72 = tpu.matmul %70, %71, %cst_30 {dimension_numbers = #tpu.dot_dimension_numbers<[1], [0], [0], [1], [0, 0, 1, 1], [], []>} : vector<8x32xbf16>, vector<32x128xbf16>, vector<8x128xf32> -> vector<8x128xf32>
    %73 = vector.extract_strided_slice %3 {offsets = [0, 96], sizes = [1, 128], strides = [1, 1]} : vector<1x224xf32> to vector<1x128xf32>
    %74 = vector.broadcast %73 : vector<1x128xf32> to vector<8x128xf32>
    %75 = arith.addf %72, %74 : vector<8x128xf32>
    %cst_31 = arith.constant 5.000000e-01 : f32
    %76 = vector.broadcast %cst_31 : f32 to vector<8x128xf32>
    %77 = arith.mulf %76, %75 : vector<8x128xf32>
    %cst_32 = arith.constant 4.471500e-02 : f32
    %78 = vector.broadcast %cst_32 : f32 to vector<8x128xf32>
    %79 = arith.mulf %78, %75 : vector<8x128xf32>
    %80 = arith.mulf %79, %75 : vector<8x128xf32>
    %81 = arith.mulf %80, %75 : vector<8x128xf32>
    %82 = arith.addf %75, %81 : vector<8x128xf32>
    %cst_33 = arith.constant 0.797884583 : f32
    %83 = vector.broadcast %cst_33 : f32 to vector<8x128xf32>
    %84 = arith.mulf %83, %82 : vector<8x128xf32>
    %85 = math.tanh %84 : vector<8x128xf32>
    %cst_34 = arith.constant 1.000000e+00 : f32
    %86 = vector.broadcast %cst_34 : f32 to vector<8x128xf32>
    %87 = arith.addf %86, %85 : vector<8x128xf32>
    %88 = arith.mulf %77, %87 : vector<8x128xf32>
    %89 = arith.truncf %88 : vector<8x128xf32> to vector<8x128xbf16>
    %cst_35 = arith.constant dense<0.000000e+00> : vector<8x32xf32>
    %90 = tpu.matmul %89, %34, %cst_35 {dimension_numbers = #tpu.dot_dimension_numbers<[1], [0], [0], [1], [0, 0, 1, 1], [], []>} : vector<8x128xbf16>, vector<128x32xbf16>, vector<8x32xf32> -> vector<8x32xf32>
    %c3 = arith.constant 3 : index
    %c0_36 = arith.constant 0 : index
    %91 = vector.load %arg7[%c3, %c0_36] : memref<6x32xf32, #tpu.memory_space<vmem>>, vector<1x32xf32>
    %92 = vector.broadcast %91 : vector<1x32xf32> to vector<8x32xf32>
    %93 = arith.addf %90, %92 : vector<8x32xf32>
    %94 = arith.addf %69, %93 : vector<8x32xf32>
    %c4 = arith.constant 4 : index
    %c0_37 = arith.constant 0 : index
    %95 = vector.load %arg7[%c4, %c0_37] : memref<6x32xf32, #tpu.memory_space<vmem>>, vector<1x32xf32>
    %c5 = arith.constant 5 : index
    %c0_38 = arith.constant 0 : index
    %96 = vector.load %arg7[%c5, %c0_38] : memref<6x32xf32, #tpu.memory_space<vmem>>, vector<1x32xf32>
    %cst_39 = arith.constant dense<0.000000e+00> : vector<8xf32>
    %97 = vector.multi_reduction <add>, %94, %cst_39 [1] : vector<8x32xf32> to vector<8xf32>
    %98 = vector.shape_cast %97 : vector<8xf32> to vector<8x1xf32>
    %cst_40 = arith.constant 3.200000e+01 : f32
    %99 = vector.broadcast %cst_40 : f32 to vector<8x1xf32>
    %100 = arith.divf %98, %99 : vector<8x1xf32>
    %101 = vector.broadcast %100 : vector<8x1xf32> to vector<8x32xf32>
    %102 = arith.subf %94, %101 : vector<8x32xf32>
    %103 = vector.broadcast %100 : vector<8x1xf32> to vector<8x32xf32>
    %104 = arith.subf %94, %103 : vector<8x32xf32>
    %105 = arith.mulf %102, %104 : vector<8x32xf32>
    %cst_41 = arith.constant dense<0.000000e+00> : vector<8xf32>
    %106 = vector.multi_reduction <add>, %105, %cst_41 [1] : vector<8x32xf32> to vector<8xf32>
    %107 = vector.shape_cast %106 : vector<8xf32> to vector<8x1xf32>
    %cst_42 = arith.constant 3.200000e+01 : f32
    %108 = vector.broadcast %cst_42 : f32 to vector<8x1xf32>
    %109 = arith.divf %107, %108 : vector<8x1xf32>
    %110 = vector.broadcast %100 : vector<8x1xf32> to vector<8x32xf32>
    %111 = arith.subf %94, %110 : vector<8x32xf32>
    %cst_43 = arith.constant 9.99999996E-13 : f32
    %112 = vector.broadcast %cst_43 : f32 to vector<8x1xf32>
    %113 = arith.addf %109, %112 : vector<8x1xf32>
    %114 = math.rsqrt %113 : vector<8x1xf32>
    %115 = vector.broadcast %114 : vector<8x1xf32> to vector<8x32xf32>
    %116 = arith.mulf %111, %115 : vector<8x32xf32>
    %117 = vector.broadcast %95 : vector<1x32xf32> to vector<8x32xf32>
    %118 = arith.mulf %116, %117 : vector<8x32xf32>
    %119 = vector.broadcast %96 : vector<1x32xf32> to vector<8x32xf32>
    %120 = arith.addf %118, %119 : vector<8x32xf32>
    %121 = vector.shape_cast %16 : vector<1x8xf32> to vector<1x1x8xf32>
    %cst_44 = arith.constant dense<0.000000e+00> : vector<1xf32>
    %122 = vector.multi_reduction <add>, %121, %cst_44 [1, 2] : vector<1x1x8xf32> to vector<1xf32>
    %123 = vector.shape_cast %122 : vector<1xf32> to vector<1x1x1xf32>
    %124 = vector.extract %123[0, 0, 0] : f32 from vector<1x1x1xf32>
    %cst_45 = arith.constant 1.000000e+00 : f32
    %125 = arith.maximumf %124, %cst_45 : f32
    %126 = vector.broadcast %125 : f32 to vector<1x8xf32>
    %127 = arith.divf %16, %126 : vector<1x8xf32>
    %cst_46 = arith.constant dense<0.000000e+00> : vector<1x32xf32>
    %128 = tpu.matmul %127, %120, %cst_46 {dimension_numbers = #tpu.dot_dimension_numbers<[1], [0], [0], [1], [0, 0, 1, 1], [], []>} : vector<1x8xf32>, vector<8x32xf32>, vector<1x32xf32> -> vector<1x32xf32>
    %c0_47 = arith.constant 0 : index
    %c0_48 = arith.constant 0 : index
    %c0_49 = arith.constant 0 : index
    %129 = vector.load %arg8[%c0_47, %c0_48, %c0_49] : memref<1x1x32xf32, #tpu.memory_space<vmem>>, vector<1x1x32xf32>
    %130 = vector.shape_cast %129 : vector<1x1x32xf32> to vector<1x32xf32>
    %131 = vector.shape_cast %128 : vector<1x32xf32> to vector<1x1x32xf32>
    tpu.vector_store %arg8[%c0_47, %c0_48, %c0_49], %131 {strides = array<i32>} : memref<1x1x32xf32, #tpu.memory_space<vmem>>, vector<1x1x32xf32>,
    return
  }
  func.func @transform_0(%arg0: i32) -> (i32, i32, i32) {
    %c0_i32 = arith.constant 0 : i32
    %c0_i32_0 = arith.constant 0 : i32
    %c0_i32_1 = arith.constant 0 : i32
    return %arg0, %c0_i32, %c0_i32_0 : i32, i32, i32
  }
  func.func @transform_1(%arg0: i32) -> (i32, i32, i32) {
    %c0_i32 = arith.constant 0 : i32
    %c0_i32_0 = arith.constant 0 : i32
    %c0_i32_1 = arith.constant 0 : i32
    return %arg0, %c0_i32, %c0_i32_0 : i32, i32, i32
  }
  func.func @transform_2(%arg0: i32) -> (i32, i32) {
    %c0_i32 = arith.constant 0 : i32
    %c0_i32_0 = arith.constant 0 : i32
    %c0_i32_1 = arith.constant 0 : i32
    return %c0_i32, %c0_i32_0 : i32, i32
  }
  func.func @transform_3(%arg0: i32) -> (i32, i32) {
    %c0_i32 = arith.constant 0 : i32
    %c0_i32_0 = arith.constant 0 : i32
    %c0_i32_1 = arith.constant 0 : i32
    return %c0_i32, %c0_i32_0 : i32, i32
  }
  func.func @transform_4(%arg0: i32) -> (i32, i32) {
    %c0_i32 = arith.constant 0 : i32
    %c0_i32_0 = arith.constant 0 : i32
    %c0_i32_1 = arith.constant 0 : i32
    return %c0_i32, %c0_i32_0 : i32, i32
  }
  func.func @transform_5(%arg0: i32) -> (i32, i32) {
    %c0_i32 = arith.constant 0 : i32
    %c0_i32_0 = arith.constant 0 : i32
    %c0_i32_1 = arith.constant 0 : i32
    return %c0_i32, %c0_i32_0 : i32, i32
  }
  func.func @transform_6(%arg0: i32) -> (i32, i32) {
    %c0_i32 = arith.constant 0 : i32
    %c0_i32_0 = arith.constant 0 : i32
    %c0_i32_1 = arith.constant 0 : i32
    return %c0_i32, %c0_i32_0 : i32, i32
  }
  func.func @transform_7(%arg0: i32) -> (i32, i32, i32) {
    %c0_i32 = arith.constant 0 : i32
    %c0_i32_0 = arith.constant 0 : i32
    %c0_i32_1 = arith.constant 0 : i32
    return %arg0, %c0_i32, %c0_i32_0 : i32, i32, i32
  }
}

</mosaic_0001>

<bundles_post_ra>
// kernel: embedder_forward.1
= control target key start
LH: loop header
LB: loop body
LE: loop exit
PB: predicated region body
PF: predicated region fallthrough
CT: control target
= control target key end

     0   :  { %12 = vsyncpa [#allocation3], 0  ;;  %s1493_s0 = inlined_call_operand.vmem [shape: f32[2,8,32], index: 0, kind: input, shape index: {}]   ;;  %s1494_s1 = inlined_call_operand.vmem [shape: f32[2,1,8], index: 1, kind: input, shape index: {}]   ;;  %s1495_s2 = inlined_call_operand.vmem [shape: bf16[32,96], index: 2, kind: input, shape index: {}]   ;;  %s1496_s3 = inlined_call_operand.vmem [shape: bf16[160,32], index: 3, kind: input, shape index: {}]   ;;  %s1497_s4 = inlined_call_operand.vmem [shape: bf16[32,128], index: 4, kind: input, shape index: {}]   ;;  %s1498_s5 = inlined_call_operand.vmem [shape: f32[1,224], index: 5, kind: input, shape index: {}]   ;;  %s1499_s6 = inlined_call_operand.vmem [shape: f32[6,32], index: 6, kind: input, shape index: {}]   ;;  %s1500_s7 = inlined_call_operand.hbm [shape: f32[2,1,32], index: 7, kind: output, shape index: {}]  }
   0x1   :  { %14 = vsyncpa [#allocation3 + $0x1], 0  ;;  %s1256_s24 = smov 0   ;;  %s1258_s25 = smov 0  }
   0x2   :  { %s1260_s26 = smov 0   ;;  %s1262_s27 = smov 0  }
   0x3 LB: > { %s1277_s28 = sadd.s32 4294967295, %s1207_s27   ;;  %s952_s29 = sadd.s32 4294967294, %s1207_s27   ;;  %s1207_s27 = sphi %s1262_s27, %s1506_s27   ;;  %s1203_s26 = sphi %s1260_s26, %s1505_s26   ;;  %s1199_s25 = sphi %s1258_s25, %s1504_s25   ;;  %s1195_s24 = sphi %s1256_s24, %s1503_s24  }
   0x4   : > { %s1281_s30 = sadd.s32 1, %s1207_s27   ;;  %s184_s8 = sadd.s32 1, %s1203_s26 }
   0x5   : > { %s181_s9 = ssub.s32 %s1207_s27, %s1281_s30  ;;  %p194_p0 = scmp.ne.s32.totalorder %s1203_s26, %s1199_s25 }
   0x6   : > { %p182_p1 = scmp.eq.s32.totalorder %s181_s9, 0  ;;  %p195_p2 = scmp.eq.s32.totalorder %s1277_s28, 1 }
   0x7   : > { %p200_p3 = scmp.ne.s32.totalorder %s1199_s25, %s1195_s24  ;;  %p201_p4 = scmp.eq.s32.totalorder %s952_s29, 1 }
   0x8   : > { %s1292_s10 = scalar_select %p182_p1, %s1203_s26, %s184_s8  }
   0x9   : > { %p1294_p5 = por %p195_p2, %p194_p0  ;;  %p1298_p6 = por %p201_p4, %p200_p3 }
   0xa   : > { %p955_p7 = scmp.ge.s32.totalorder %s1207_s27, 1  ;;  %p247_p8 = scmp.lt.s32.totalorder %s1207_s27, 3 }
   0xc   : > { %p248_p9 = pnand %p955_p7, %p247_p8 }
   0xd   : > { %v1119_v0 = vld [vmem:[%s1495_s2] sm:$0xff] (!%p248_p9)   ;;  %v1209_v1 = vmov (!%p248_p9), 0.0   ;;  %v1120_v2 = vld [vmem:[%s1495_s2 + $0x8] sm:$0xff] (!%p248_p9)   ;;  %vm1210_vm0 = vmmov (!%p248_p9), 0   ;;  %p280_p10 = scmp.lt.s32.totalorder (!%p248_p9), %s1277_s28, 1  ;;  %vm313_vm1 = vcmask (!%p248_p9), 261120   ;;  %v296_v5 = vlaneseq (!%p248_p9) }
   0xe   : > { %251 = sbr.rel (%p248_p9) target bundleno = 2639 (0xa4f), region = 48  ;;  %1011 = vmatprep.subr.bf16.mxu0 (!%p248_p9), %v1209_v1  ;;  %1031 = vmatprep.subr.bf16.mxu1 (!%p248_p9), %v1209_v1  ;;  %v1339_v8 = vld [vmem:[%s1498_s5] sm:$0x3] (!%p248_p9)  ;;  %s1211_s29 = smov (!%p248_p9), 96   ;;  %vm416_vm2 = vcmask (!%p248_p9), 64512   ;;  %vm454_vm3 = vcmask (!%p248_p9), 1043456  }
   0xf   : > { %1012 = vmatpush3.bf16.msra.mxu0 (!%p248_p9), %v1119_v0  ;;  %1015 = vmatprep.mubr.msk.bf16.mxu0 (!%p248_p9), %vm1210_vm0, %v1209_v1  ;;  %v1333_v6 = vshrl.u32 (!%p248_p9), %v296_v5, 7  ;;  %s1212_s14 = smov (!%p248_p9), 64   ;;  %v1121_v33 = vld [vmem:[%s1496_s3] sm:$0xff] (!%p248_p9)   ;;  %v1122_v40 = vld [vmem:[%s1496_s3 + $0x8] sm:$0xff] (!%p248_p9)   ;;  %v1125_v62 = vld [vmem:[%s1496_s3 + $0x10] sm:$0xff] (!%p248_p9)   ;;  %vm785_vm4 = vcmask (!%p248_p9), 57344  }
  0x10   : > { %1013 = vmatprep.subr.bf16.mxu0 (!%p248_p9), %v1209_v1  ;;  %1035 = vmatprep.mubr.msk.bf16.mxu1 (!%p248_p9), %vm1210_vm0, %v1209_v1  ;;  %v963_v46 = vld [vmem:[%s1499_s6] ss:$0 sm:$0xff] (!%p248_p9)  ;;  %v1124_v60 = vld [vmem:[%s1497_s4 + $0x8] sm:$0xff] (!%p248_p9)   ;;  %v967_v5 = vld [vmem:[%s1499_s6 + $0x1] ss:$0 sm:$0xff] (!%p248_p9)  ;;  %vm873_vm5 = vcmask (!%p248_p9), 253952  }
  0x11   : > { %v298_v7 = vsub.s32 (!%p248_p9), 0, %v1333_v6  ;;  %1032 = vmatpush3.bf16.msra.mxu1 (!%p248_p9), %v1121_v33  ;;  %v1123_v59 = vld [vmem:[%s1497_s4] sm:$0xff] (!%p248_p9)   ;;  %v593_v61 = vsub.s32 (!%p248_p9), 1, %v1333_v6 }
  0x12   : > { %1033 = vmatprep.subr.bf16.mxu1 (!%p248_p9), %v1209_v1 }
  0x13   : > { %1014 = vmatpush3.bf16.msra.mxu0 (!%p248_p9), %v1120_v2  ;;  %v1342_v9 = vrot.slane (!%p248_p9), %v1339_v8, %v298_v7  ;;  %v594_v63 = vrot.slane (!%p248_p9), %v1339_v8, %v593_v61 }
  0x14   : > { %1019 = vmatprep.subr.bf16.mxu0 (!%p248_p9), %v1209_v1 }
  0x15   : > { %s1319_s17 = scalar_select %p280_p10, %s1277_s28, 1  ;;  %1034 = vmatpush3.bf16.msra.mxu1 %v1122_v40 }
  0x16   : > { %1047 = vmatprep.subr.bf16.mxu1 %v1209_v1 }
  0x17   : > { %s956_s18 = sshll.u32 %s1319_s17, 3  ;;  %s286_s13 = scalar_lea.vmem %s1494_s1, %s1319_s17 }
  0x18   : > { %s283_s21 = scalar_lea.vmem %s1493_s0, %s956_s18  ;;  %v1354_v18 = vld [vmem:[%s286_s13] sm:$0x1]  ;;  %s1213_s13 = smov 32  }
  0x19   : > { %v1326_v3 = vld [vmem:[%s283_s21] sm:$0xff]  ;;  %v960_v19 = vadd.f32 -1.0, %v1354_v18  ;;  %s1214_s21 = smov 1.0  }
  0x1a   : > { %v289_v4 = vpack.c.bf16 %v1326_v3, %v1326_v3 }
  0x1b   : > { %v360_v20 = vmul.f32 1e+09, %v960_v19 }
  0x1c   : > { %1016 = vmatmul.mubr.msk.bf16.vlgmr.msra.gmra.mrb[0].mxu0 %vm313_vm1, %v289_v4 }
  0x1d   : > { %1021 = vmatprep.mubr.msk.bf16.mxu0 %vm1210_vm0, %v1209_v1  ;;  %v365_v21 = vrot.slane %v360_v20, %v298_v7  ;;  %v968_v7 = vld [vmem:[%s1499_s6 + $0x2] ss:$0 sm:$0xff] }
  0xef   : > { %v351_v10 = vpop.f32.mrb[0].mxu0 }
  0xf0   : > { %v352_v11 = vadd.f32 %v351_v10, %v1342_v9  ;;  %v1017_v12 = vpop.f32.mrb[1].mxu0 }
  0xf1   : > { %v354_v13 = vpop.f32.mrb[2].mxu0  ;;  %v1127_v12 = vld [vmem:[%s1496_s3 + $0x20] sm:$0xff]  }
  0xf2   : > { %v357_v14 = vpack.c.bf16 %v352_v11, %v352_v11  ;;  %v1018_v15 = vpop.f32.mrb[3].mxu0  ;;  %v1126_v11 = vld [vmem:[%s1496_s3 + $0x18] sm:$0xff]   ;;  %v1128_v13 = vld [vmem:[%s1496_s3 + $0x28] sm:$0xff]  }
  0xf3   : > { %v1130_v15 = vld [vmem:[%s1496_s3 + $0x38] sm:$0xff]  }
  0xf4   : > { %368 = vrot.lane.b32.xlu0 %v357_v14, %s1211_s29 }
 0x166   : > { %v369_v16 = vpop.permute.xlu0 %368 }
 0x167   : > { %v374_v17 = vsel %vm313_vm1, %v369_v16, 0  ;;  %v1131_v16 = vld [vmem:[%s1496_s3 + $0x40] sm:$0xff]  }
 0x168   : > { %1020 = vmatpush3.bf16.xpose.msra.mxu0 %v374_v17  ;;  %v1132_v17 = vld [vmem:[%s1496_s3 + $0x48] sm:$0xff]  }
 0x169   : > { %1025 = vmatprep.subr.bf16.mxu0 %v1209_v1 }
 0x16f   : > { %1022 = vmatmul.mubr.msk.bf16.vlgmr.msra.gmra.mrb[4].mxu0 %vm313_vm1, %v357_v14 }
 0x170   : > { %1027 = vmatprep.mubr.msk.bf16.mxu0 %vm1210_vm0, %v1209_v1 }
 0x242   : > { %v410_v22 = vpop.f32.mrb[4].mxu0 }
 0x243   : > { %v411_v23 = vadd.f32 %v410_v22, %v365_v21  ;;  %v1023_v24 = vpop.f32.mrb[5].mxu0 }
 0x244   : > { %v413_v25 = vpop.f32.mrb[6].mxu0 }
 0x245   : > { %v1024_v26 = vpop.f32.mrb[7].mxu0  ;;  %v417_v27 = vsel %vm416_vm2, %v411_v23, -inf }
 0x246   : > { %418 = vmax.xlane.f32.xlu0 %v417_v27 }
 0x2d3   : > { %v419_v28 = vpop.xlane.xlu0 %418 }
 0x2d4   : > { %v420_v29 = vsub.f32 %v411_v23, %v419_v28 }
 0x2d6   : > { %v421_v30 = vmul.f32 1.442695, %v420_v29 }
 0x2d8   : > { %1133 = vpow2.f32 %v421_v30 }
 0x2e2   : > { %v1134_v31 = vpop.eup %1133 }
 0x2e3   : > { %v423_v32 = vsel %vm416_vm2, %v1134_v31, 0.0 }
 0x2e4   : > { %424 = vadd.xlane.f32.xlu1 %v423_v32 }
 0x2f5   : > { %449 = vrot.lane.b32.xlu1 %v357_v14, %s1212_s14  ;;  %v1129_v14 = vld [vmem:[%s1496_s3 + $0x30] sm:$0xff]   ;;  %s984_s14 = sshll.u32 %s1277_s28, 4  ;;  %s1215_s28 = smov [#allocation2]  }
 0x2f6   : > { %s1451_s19 = scalar_lea.hbm %s1500_s7, %s984_s14 }
 0x371   : > { %v425_v34 = vpop.xlane.xlu1 %424 }
 0x372   : > { %1135 = vrcp.f32 %v425_v34 }
 0x375   : > { %v450_v35 = vpop.permute.xlu1 %449 }
 0x376   : > { %v456_v36 = vsel %vm454_vm3, %v450_v35, 0 }
 0x377   : > { %1026 = vmatpush3.bf16.msra.mxu0 %v456_v36  ;;  %v786_v36 = vsel %vm785_vm4, %v1354_v18, 0.0 }
 0x378   : > { %1039 = vmatprep.subr.bf16.mxu0 %v1209_v1 }
 0x37c   : > { %v1136_v37 = vpop.eup %1135 }
 0x37d   : > { %v427_v38 = vmul.f32 %v1136_v37, %v1134_v31  ;;  %v972_v37 = vld [vmem:[%s1499_s6 + $0x3] ss:$0 sm:$0xff] }
 0x37f   : > { %v448_v39 = vpack.c.bf16 %v427_v38, %v427_v38 }
 0x381   : > { %1028 = vmatmul.mubr.msk.bf16.vlgmr.msra.gmra.mrb[8].mxu0 %vm416_vm2, %v448_v39 }
 0x382   : > { %1043 = vmatprep.mubr.msk.bf16.mxu0 %vm1210_vm0, %v1209_v1  ;;  %1040 = vmatpush3.bf16.msra.mxu0 %v1123_v59 }
 0x383   : > { %1041 = vmatprep.subr.bf16.mxu0 %v1209_v1 }
 0x386   : > { %1042 = vmatpush3.bf16.msra.mxu0 %v1124_v60 }
 0x387   : > { %1067 = vmatprep.subr.mxu0 %v1209_v1 }
 0x454   : > { %v492_v41 = vpop.f32.mrb[8].mxu0 }
 0x455   : > { %v498_v42 = vpack.c.bf16 %v492_v41, %v492_v41  ;;  %v1029_v43 = vpop.f32.mrb[9].mxu0 }
 0x456   : > { %v495_v44 = vpop.f32.mrb[10].mxu0 }
 0x457   : > { %v1030_v45 = vpop.f32.mrb[11].mxu0  ;;  %1036 = vmatmul.mubr.msk.bf16.vlgmr.msra.gmra.mrb[0].mxu1 %vm313_vm1, %v498_v42 }
 0x458   : > { %1063 = vmatprep.mubr.msk.bf16.mxu1 %vm1210_vm0, %v1209_v1  ;;  %1048 = vmatpush3.bf16.msra.mxu1 %v1125_v62  ;;  %v981_v62 = vld [vmem:[%s1499_s6 + $0x4] ss:$0 sm:$0xff] }
 0x459   : > { %1049 = vmatprep.subr.bf16.mxu1 %v1209_v1 }
 0x45c   : > { %1050 = vmatpush3.bf16.msra.mxu1 %v1126_v11 }
 0x45d   : > { %1051 = vmatprep.subr.bf16.mxu1 %v1209_v1 }
 0x460   : > { %1052 = vmatpush3.bf16.msra.mxu1 %v1127_v12 }
 0x461   : > { %1053 = vmatprep.subr.bf16.mxu1 %v1209_v1 }
 0x464   : > { %1054 = vmatpush3.bf16.msra.mxu1 %v1128_v13 }
 0x465   : > { %1055 = vmatprep.subr.bf16.mxu1 %v1209_v1 }
 0x468   : > { %1056 = vmatpush3.bf16.msra.mxu1 %v1129_v14 }
 0x469   : > { %1057 = vmatprep.subr.bf16.mxu1 %v1209_v1 }
 0x46c   : > { %1058 = vmatpush3.bf16.msra.mxu1 %v1130_v15 }
 0x46d   : > { %1059 = vmatprep.subr.bf16.mxu1 %v1209_v1 }
 0x470   : > { %1060 = vmatpush3.bf16.msra.mxu1 %v1131_v16 }
 0x471   : > { %1061 = vmatprep.subr.bf16.mxu1 %v1209_v1 }
 0x474   : > { %1062 = vmatpush3.bf16.msra.mxu1 %v1132_v17 }
 0x52a   : > { %v553_v47 = vpop.f32.mrb[0].mxu1 }
 0x52b   : > { %v554_v48 = vadd.f32 %v963_v46, %v553_v47  ;;  %v1037_v49 = vpop.f32.mrb[1].mxu1 }
 0x52c   : > { %v556_v50 = vpop.f32.mrb[2].mxu1 }
 0x52d   : > { %v1038_v51 = vpop.f32.mrb[3].mxu1  ;;  %v559_v52 = vadd.f32 %v554_v48, %v1326_v3 }
 0x52f   : > { %v562_v53 = vsel %vm313_vm1, %v559_v52, 0.0 }
 0x530   : > { %563 = vadd.xlane.f32.xlu1 %v562_v53 }
 0x541   : > { %609 = vrot.lane.b32.xlu1 %v594_v63, %s1213_s13 }
 0x565   : > { %787 = vadd.xlane.f32.xlu1 %v786_v36 }
 0x5bd   : > { %v564_v54 = vpop.xlane.xlu1 %563 }
 0x5be   : > { %v566_v55 = vmul.f32 0.03125, %v564_v54 }
 0x5c0   : > { %v567_v56 = vsub.f32 %v559_v52, %v566_v55 }
 0x5c1   : > { %v610_v20 = vpop.permute.xlu1 %609 }
 0x5c2   : > { %v568_v57 = vmul.f32 %v567_v56, %v567_v56 }
 0x5c4   : > { %v569_v58 = vsel %vm313_vm1, %v568_v57, 0.0 }
 0x5c5   : > { %570 = vadd.xlane.f32.xlu0 %v569_v58 }
 0x5db   : > { %607 = vrot.lane.b32.xlu0 %v1342_v9, %s1213_s13  ;;  %s278_s13 = sand.u32 1, %s1199_s25  }
 0x5dc   : > { %s279_s15 = scalar_lea.vmem [#allocation2], %s278_s13 }
 0x5dd   : > { %s888_s16 = sshll.u32 %s279_s15, 4  ;;  %s1453_s16 = int_to_ptr.vmem [resolvable:$true] %s888_s16 }
 0x5f2   : > { %v788_v45 = vpop.xlane.xlu1 %787 }
 0x5f3   : > { %v789_v46 = vrot.slane %v788_v45, 4 }
 0x5f5   : > { %v790_v47 = vadd.f32 %v789_v46, %v788_v45 }
 0x5f7   : > { %v791_v48 = vrot.slane %v790_v47, 2 }
 0x5f9   : > { %v792_v49 = vadd.f32 %v791_v48, %v790_v47 }
 0x5fb   : > { %v793_v50 = vrot.slane %v792_v49, 1 }
 0x5fd   : > { %v794_v51 = vadd.f32 %v793_v50, %v792_v49 }
 0x5ff   : > { %1072 = vpush %v794_v51 }
 0x630   : > { %s1073_s20 = spop %1072 }
 0x631   : > { %s796_s22 = smax.f32 %s1214_s21, %s1073_s20  ;;  %s876_s20 = scalar_lea.sflag [#allocation3], %s278_s13 }
 0x632   : > { %v797_v60 = vstv %s796_s22  ;;  %s1145_s21 = scalar_lea.vmem %s1453_s16, 16  ;;  %s1149_s22 = sshll.u32 %s1215_s28, 4  ;;  %s1150_s22 = int_to_ptr.vmem [resolvable:$false] %s1149_s22 }
 0x633   : > { %p1146_p11 = scmp.ne.s32.totalorder %s1453_s16, %s1145_s21  ;;  %s1151_s23 = scalar_lea.vmem %s1150_s22, 32 }
 0x634   : > { %p1152_p0 = scmp.lt.s32.totalorder %s1453_s16, %s1150_s22  ;;  %p1153_p1 = scmp.lt.s32.totalorder %s1151_s23, %s1145_s21 }
 0x635   : > { %p1147_p12 = pnand %p1146_p11, %p1294_p5 }
 0x636   : > { %p1154_p2 = por %p1153_p1, %p1152_p0 }
 0x637   : > { %p1148_p13 = pneg %p1147_p12 }
 0x639   : > { %p1155_p3 = pnand %p1154_p2, %p1148_p13 }
 0x652   : > { %v571_v0 = vpop.xlane.xlu0 %570 }
 0x653   : > { %v572_v2 = vmul.f32 0.03125, %v571_v0  ;;  %v982_v0 = vld [vmem:[%s1499_s6 + $0x5] ss:$0 sm:$0xff] }
 0x655   : > { %v573_v3 = vadd.f32 1e-12, %v572_v2 }
 0x656   : > { %v608_v19 = vpop.permute.xlu0 %607 }
 0x657   : > { %1137 = vrsqrt.f32 %v573_v3  ;;  %v611_v21 = vsel %vm313_vm1, %v608_v19, %v610_v20 }
 0x661   : > { %v1138_v4 = vpop.eup %1137 }
 0x662   : > { %v575_v6 = vmul.f32 %v1138_v4, %v567_v56 }
 0x664   : > { %v580_v9 = vmul.f32 %v967_v5, %v575_v6 }
 0x666   : > { %v585_v8 = vadd.f32 %v968_v7, %v580_v9 }
 0x668   : > { %v586_v10 = vpack.c.bf16 %v585_v8, %v585_v8 }
 0x66a   : > { %1044 = vmatmul.mubr.msk.bf16.vlgmr.msra.gmra.mrb[12].mxu0 %vm313_vm1, %v586_v10 }
 0x66b   : > { %1069 = vmatprep.mubr.msk.f32.mxu0 %vm1210_vm0, %v1209_v1 }
 0x73d   : > { %v650_v22 = vpop.f32.mrb[12].mxu0 }
 0x73e   : > { %v651_v23 = vadd.f32 %v650_v22, %v611_v21  ;;  %v1045_v24 = vpop.f32.mrb[13].mxu0 }
 0x73f   : > { %v653_v25 = vpop.f32.mrb[14].mxu0 }
 0x740   : > { %v657_v26 = vmul.f32 0.044715, %v651_v23  ;;  %v1046_v27 = vpop.f32.mrb[15].mxu0  ;;  %v656_v33 = vmul.f32 0.5, %v651_v23 }
 0x742   : > { %v658_v28 = vmul.f32 %v657_v26, %v651_v23 }
 0x744   : > { %v659_v29 = vmul.f32 %v658_v28, %v651_v23 }
 0x746   : > { %v660_v30 = vadd.f32 %v659_v29, %v651_v23 }
 0x748   : > { %v661_v31 = vmul.f32 0.7978846, %v660_v30 }
 0x74a   : > { %1139 = vtanh.f32 %v661_v31 }
 0x754   : > { %v1140_v32 = vpop.eup %1139 }
 0x755   : > { %v663_v34 = vadd.f32 1.0, %v1140_v32 }
 0x757   : > { %v664_v1 = vmul.f32 %v663_v34, %v656_v33 }
 0x759   : > { %v665_v35 = vpack.c.bf16 %v664_v1, %v664_v1 }
 0x75b   : > { %1064 = vmatmul.mubr.bf16.vlgmr.msra.gmra.mrb[4].mxu1 %v665_v35 }
 0x82e   : > { %v753_v38 = vpop.f32.mrb[4].mxu1 }
 0x82f   : > { %v754_v39 = vadd.f32 %v972_v37, %v753_v38  ;;  %v1065_v40 = vpop.f32.mrb[5].mxu1 }
 0x830   : > { %v756_v41 = vpop.f32.mrb[6].mxu1 }
 0x831   : > { %v1066_v42 = vpop.f32.mrb[7].mxu1  ;;  %v759_v43 = vadd.f32 %v754_v39, %v585_v8 }
 0x833   : > { %v762_v44 = vsel %vm313_vm1, %v759_v43, 0.0 }
 0x834   : > { %763 = vadd.xlane.f32.xlu0 %v762_v44 }
 0x8c1   : > { %v764_v52 = vpop.xlane.xlu0 %763 }
 0x8c2   : > { %v765_v53 = vmul.f32 0.03125, %v764_v52 }
 0x8c4   : > { %v766_v54 = vsub.f32 %v759_v43, %v765_v53 }
 0x8c6   : > { %v767_v55 = vmul.f32 %v766_v54, %v766_v54 }
 0x8c8   : > { %v768_v56 = vsel %vm313_vm1, %v767_v55, 0.0 }
 0x8c9   : > { %769 = vadd.xlane.f32.xlu0 %v768_v56 }
 0x956   : > { %v770_v57 = vpop.xlane.xlu0 %769 }
 0x957   : > { %v771_v58 = vmul.f32 0.03125, %v770_v57 }
 0x959   : > { %v772_v59 = vadd.f32 1e-12, %v771_v58 }
 0x95b   : > { %1141 = vrsqrt.f32 %v772_v59 }
 0x95c   : > { %1143 = vrcp.f32 %v797_v60 }
 0x965   : > { %v1142_v61 = vpop.eup %1141 }
 0x966   : > { %v774_v63 = vmul.f32 %v1142_v61, %v766_v54  ;;  %v1144_v2 = vpop.eup %1143 }
 0x967   : > { %v799_v5 = vmul.f32 %v1144_v2, %v1354_v18 }
 0x968   : > { %v779_v3 = vmul.f32 %v981_v62, %v774_v63 }
 0x96a   : > { %v784_v4 = vadd.f32 %v982_v0, %v779_v3 }
 0x96c   : > { %1068 = vmatpush3.msra.mxu0 %v784_v4 }
 0x96d   : > { %1070 = vmatmul.mubr.msk.f32.vlgmr.msra.gmra.mrb[16].mxu0 %vm416_vm2, %v799_v5 }
 0xa40   : > { %v869_v18 = vpop.f32.mrb[16].mxu0 }
 0xa41   : > { %874 = vst.msk [vmem:[%s279_s15] sm:$0x1] %vm873_vm5, %v869_v18  ;;  %v1071_v6 = vpop.f32.mrb[17].mxu0 }
 0xa42   : > { %1158 = shalt.err (!%p1155_p3)
}
 0xa43   : > { %s1159_s29 = scalar_lea.hbm %s1451_s19, 16  ;;  %s1163_s13 = scalar_lea.hbm %s1500_s7, 32 }
 0xa44   : > { %p1160_p4 = scmp.ne.s32.totalorder %s1451_s19, %s1159_s29  ;;  %p1164_p9 = scmp.lt.u32.totalorder %s1451_s19, %s1500_s7 }
 0xa45   : > { %p1165_p10 = scmp.lt.u32.totalorder %s1163_s13, %s1159_s29  ;;  %p1167_p12 = scmp.lt.u32.totalorder %s1159_s29, %s1451_s19 }
 0xa46   : > { %p1161_p7 = pnand %p1160_p4, %p1294_p5 }
 0xa47   : > { %p1166_p11 = por %p1165_p10, %p1164_p9 }
 0xa48   : > { %p1162_p8 = pneg %p1161_p7 }
 0xa49   : > { %p1168_p13 = por %p1167_p12, %p1166_p11 }
 0xa4b   : > { %p1169_p0 = pnand %p1168_p13, %p1162_p8 }
 0xa4d   : > { %1172 = shalt.err (!%p1169_p0)
}
 0xa4e   : > { %1074 = dma.vmem_to_hbm [thread:$0]  (%p1294_p5), %s1453_s16, 16, %s1451_s19, %s876_s20  }
 0xa4f PF: > { %p1080_p1 = scmp.ge.s32.totalorder %s1207_s27, 2  ;;  %s900_s17 = sand.u32 1, %s1195_s24  }
 0xa50   : > { %s901_s18 = scalar_lea.sflag [#allocation3], %s900_s17 }
 0xa51   : > { %p1077_p2 = pnand %p1080_p1, %p1298_p6 }
 0xa53   : > { %1190 = dma.done.wait (!%p1077_p2), %s901_s18, 16  }
 0xa54   : > { %1192 = vsyncadd (!%p1077_p2), %s901_s18, 4294967280  ;;  %p17_p3 = scmp.ge.s32.totalorder %s1281_s30, 4   ;;  %s1503_s24 = smov %s1199_s25 }
 0xa55   : > { %s1504_s25 = smov %s1203_s26  ;;  %s1505_s26 = smov %s1292_s10 }
 0xa56   : > { %s1506_s27 = smov %s1281_s30  ;;  %19 = sbr.rel (!%p17_p3) target bundleno = 3 (0x3), region = 86 }
 0xa5d   :  { %905 = vsyncpa [#allocation3], 1 }
 0xa5e   :  { %907 = vsyncpa [#allocation3 + $0x1], 1 }

</bundles_post_ra>
